<compile_context>
chip_gen: v7x
topology: tpu7x:2x2x1
jax: 0.10.0
libtpu: 0.0.40
codegen_flags: <defaults>
</compile_context>

<pallas_src>
import functools

import jax
import jax.numpy as jnp
from jax.experimental import pallas as pl
from jax.experimental.pallas import tpu as pltpu

BN_EPS = 1e-5
LEAKY_SLOPE = 1.0  # nn.LeakyReLU(True) -> negative_slope = float(True) = 1.0


def _leaky_relu(x, slope):
    return jnp.where(x >= 0, x, slope * x)


# -----------------------------------------------------------------------------
# Kernel: one batch tile of the folded affine map (+ sigmoid).
# -----------------------------------------------------------------------------
def _fmlp_affine_kernel(x_ref, w_ref, b_ref, out_ref, *, sigm):
    # x_ref: (TB, C*D)  w_ref: (C*D, 1)  b_ref: (1, 1)  out_ref: (TB, 1)
    y = jnp.dot(x_ref[...], w_ref[...], preferred_element_type=jnp.float32)
    y = y + b_ref[...]                      # broadcast (1,1) -> (TB,1)
    if sigm:
        y = 1.0 / (1.0 + jnp.exp(-y))       # sigmoid (EUP exp + divide)
    out_ref[...] = y.astype(out_ref.dtype)


# -----------------------------------------------------------------------------
# Host-side folding of all layers into a single (C*D, 1) weight + scalar bias.
# -----------------------------------------------------------------------------
def fold_params(p):
    c_in = p["c_in"]
    # seq1 per channel: x_c @ A + bias10  (identical for every channel)
    s1 = p["g1"] / jnp.sqrt(p["rv1"] + BN_EPS)                           # (10,)
    A = (p["w1"].T @ p["w2"].T) * s1                                     # (D, 10)
    bias10 = (p["b1"] @ p["w2"].T + p["b2"] - p["rm1"]) * s1 + p["be1"]  # (10,)

    # seq2 first Linear: concat_c(h_c) @ W3^T + b3, expressed per channel.
    w3t = p["w3"].T                                                      # (10*C, 20)
    blocks = [A @ w3t[c * 10:(c + 1) * 10, :] for c in range(c_in)]      # (D, 20) each
    w_cd20 = jnp.concatenate(blocks, axis=0)                             # (C*D, 20)
    b20 = sum(bias10 @ w3t[c * 10:(c + 1) * 10, :] for c in range(c_in)) + p["b3"]

    # BN2 (eval, affine) folded into the (C*D, 20) map.
    s2 = p["g2"] / jnp.sqrt(p["rv2"] + BN_EPS)                           # (20,)
    w_cd20 = w_cd20 * s2
    b20 = (b20 - p["rm2"]) * s2 + p["be2"]

    # Final Linear(20, 1).
    w_eff = (w_cd20 @ p["w4"].T).astype(jnp.float32)                     # (C*D, 1)
    b_eff = (b20 @ p["w4"].T + p["b4"]).astype(jnp.float32)              # (1,)
    return w_eff, b_eff.reshape(1, 1)


# -----------------------------------------------------------------------------
# Wrapper: fold params, tile batch, launch.
# -----------------------------------------------------------------------------
def fmlp_forward(x, params, *, sigm=True, block_b=1024):
    """x: (B, C, D) float32 -> (B,) float32."""
    b, c, d = x.shape
    assert c == params["c_in"] and d == params["d_in"]
    f = c * d

    w_eff, b_eff = fold_params(params)
    x2 = x.reshape(b, f).astype(jnp.float32)   # lane-dense last dim (C*D)

    if b <= block_b:
        tb = b                                 # single block == full batch
    else:
        tb = max(8, (block_b // 8) * 8)        # multiple of 8 (sublane rule)

    kernel = functools.partial(_fmlp_affine_kernel, sigm=sigm)
    out = pl.pallas_call(
        kernel,
        out_shape=jax.ShapeDtypeStruct((b, 1), jnp.float32),
        grid=(pl.cdiv(b, tb),),
        in_specs=[
            pl.BlockSpec((tb, f), lambda i: (i, 0)),   # batch tile of x (pipelined)
            pl.BlockSpec((f, 1), lambda i: (0, 0)),    # folded weight, resident
            pl.BlockSpec((1, 1), lambda i: (0, 0)),    # folded bias, resident
        ],
        out_specs=pl.BlockSpec((tb, 1), lambda i: (i, 0)),
        compiler_params=pltpu.CompilerParams(
            dimension_semantics=("parallel",)),        # megacore split on v7x
    )(x2, w_eff, b_eff)
    return out.reshape(-1)


# -----------------------------------------------------------------------------
# Parameter init + pure-JAX reference (mirrors the PyTorch per-channel loop).
# -----------------------------------------------------------------------------
def init_params(key, d_in, c_in):
    ks = jax.random.split(key, 16)
    n = lambda k, shape, s=0.2: s * jax.random.normal(k, shape, jnp.float32)
    return {
        "d_in": d_in, "c_in": c_in,
        # seq1: Linear(d_in,5), Linear(5,10), BatchNorm1d(10)
        "w1": n(ks[0], (5, d_in)), "b1": n(ks[1], (5,)),
        "w2": n(ks[2], (10, 5)), "b2": n(ks[3], (10,)),
        "g1": 1.0 + n(ks[4], (10,), 0.1), "be1": n(ks[5], (10,), 0.1),
        "rm1": n(ks[6], (10,), 0.1),
        "rv1": 1.0 + 0.5 * jax.random.uniform(ks[7], (10,), jnp.float32),
        # seq2: Linear(c_in*10,20), BatchNorm1d(20), Linear(20,1)
        "w3": n(ks[8], (20, c_in * 10)), "b3": n(ks[9], (20,)),
        "g2": 1.0 + n(ks[10], (20,), 0.1), "be2": n(ks[11], (20,), 0.1),
        "rm2": n(ks[12], (20,), 0.1),
        "rv2": 1.0 + 0.5 * jax.random.uniform(ks[13], (20,), jnp.float32),
        "w4": n(ks[14], (1, 20)), "b4": n(ks[15], (1,)),
    }


def ref_forward(x, p, *, sigm=True):
    b, c, d = x.shape
    outs = []
    for i in range(c):
        h = x[:, i, :] @ p["w1"].T + p["b1"]
        h = h @ p["w2"].T + p["b2"]
        h = _leaky_relu(h, LEAKY_SLOPE)                  # identity (slope 1.0)
        # Dropout: identity in eval mode.
        h = (h - p["rm1"]) / jnp.sqrt(p["rv1"] + BN_EPS) * p["g1"] + p["be1"]
        outs.append(h)
    out = jnp.concatenate(outs, axis=1)                  # (B, 10*C)
    z = out @ p["w3"].T + p["b3"]
    z = _leaky_relu(z, LEAKY_SLOPE)
    # Dropout: identity in eval mode.
    z = (z - p["rm2"]) / jnp.sqrt(p["rv2"] + BN_EPS) * p["g2"] + p["be2"]
    y = z @ p["w4"].T + p["b4"]
    if sigm:
        y = jax.nn.sigmoid(y)
    return y.reshape(-1)


if __name__ == "__main__":
    B, C, D = 48, 4, 16
    key = jax.random.PRNGKey(0)
    kx, kp = jax.random.split(key)
    x = jax.random.normal(kx, (B, C, D), jnp.float32)
    params = init_params(kp, d_in=D, c_in=C)

    # block_b=16 -> grid of 3 batch tiles, exercising the pipelined grid path.
    out = jax.block_until_ready(fmlp_forward(x, params, sigm=True, block_b=16))
    ref = ref_forward(x, params, sigm=True)

    assert out.shape == (B,)
    assert jnp.allclose(out, ref, atol=1e-5, rtol=1e-5), (out, ref)
    print("KERNEL_OK")
</pallas_src>

<mosaic_0001>
module attributes {stable_mosaic.version = 11 : i64} {
  func.func @_fmlp_affine_kernel(%arg0: i32, %arg1: memref<16x64xf32, #tpu.memory_space<vmem>>, %arg2: memref<64x1xf32, #tpu.memory_space<vmem>>, %arg3: memref<1x1xf32, #tpu.memory_space<vmem>>, %arg4: memref<16x1xf32, #tpu.memory_space<vmem>>) attributes {dimension_semantics = [#tpu.dimension_semantics<parallel>], iteration_bounds = array<i64: 3>, scalar_prefetch = 0 : i64, scratch_operands = 0 : i64, tpu.core_type = #tpu.core_type<tc>, window_params = [{transform_indices = @transform_0, window_bounds = array<i64: 16, 64>}, {pipeline_mode = #tpu.pipeline_mode<synchronous>, transform_indices = @transform_1, window_bounds = array<i64: 64, 1>}, {pipeline_mode = #tpu.pipeline_mode<synchronous>, transform_indices = @transform_2, window_bounds = array<i64: 1, 1>}, {transform_indices = @transform_3, window_bounds = array<i64: 16, 1>}]} {
    %c0 = arith.constant 0 : index
    %c0_0 = arith.constant 0 : index
    %0 = vector.load %arg1[%c0, %c0_0] : memref<16x64xf32, #tpu.memory_space<vmem>>, vector<16x64xf32>
    %c0_1 = arith.constant 0 : index
    %c0_2 = arith.constant 0 : index
    %1 = vector.load %arg2[%c0_1, %c0_2] : memref<64x1xf32, #tpu.memory_space<vmem>>, vector<64x1xf32>
    %cst = arith.constant dense<0.000000e+00> : vector<16x1xf32>
    %2 = tpu.matmul %0, %1, %cst {dimension_numbers = #tpu.dot_dimension_numbers<[1], [0], [0], [1], [0, 0, 1, 1], [], []>} : vector<16x64xf32>, vector<64x1xf32>, vector<16x1xf32> -> vector<16x1xf32>
    %c0_3 = arith.constant 0 : index
    %c0_4 = arith.constant 0 : index
    %3 = vector.load %arg3[%c0_3, %c0_4] : memref<1x1xf32, #tpu.memory_space<vmem>>, vector<1x1xf32>
    %4 = vector.broadcast %3 : vector<1x1xf32> to vector<16x1xf32>
    %5 = arith.addf %2, %4 : vector<16x1xf32>
    %cst_5 = arith.constant 0.000000e+00 : f32
    %6 = vector.broadcast %cst_5 : f32 to vector<16x1xf32>
    %7 = arith.subf %6, %5 : vector<16x1xf32>
    %8 = math.exp %7 : vector<16x1xf32>
    %cst_6 = arith.constant 1.000000e+00 : f32
    %9 = vector.broadcast %cst_6 : f32 to vector<16x1xf32>
    %10 = arith.addf %9, %8 : vector<16x1xf32>
    %cst_7 = arith.constant 1.000000e+00 : f32
    %11 = vector.broadcast %cst_7 : f32 to vector<16x1xf32>
    %12 = arith.divf %11, %10 : vector<16x1xf32>
    %c0_8 = arith.constant 0 : index
    %c0_9 = arith.constant 0 : index
    %13 = vector.load %arg4[%c0_8, %c0_9] : memref<16x1xf32, #tpu.memory_space<vmem>>, vector<16x1xf32>
    tpu.vector_store %arg4[%c0_8, %c0_9], %12 {strides = array<i32>} : memref<16x1xf32, #tpu.memory_space<vmem>>, vector<16x1xf32>,
    return
  }
  func.func @transform_0(%arg0: i32) -> (i32, i32) {
    %c0_i32 = arith.constant 0 : i32
    %c0_i32_0 = arith.constant 0 : i32
    return %arg0, %c0_i32 : i32, i32
  }
  func.func @transform_1(%arg0: i32) -> (i32, i32) {
    %c0_i32 = arith.constant 0 : i32
    %c0_i32_0 = arith.constant 0 : i32
    %c0_i32_1 = arith.constant 0 : i32
    return %c0_i32, %c0_i32_0 : i32, i32
  }
  func.func @transform_2(%arg0: i32) -> (i32, i32) {
    %c0_i32 = arith.constant 0 : i32
    %c0_i32_0 = arith.constant 0 : i32
    %c0_i32_1 = arith.constant 0 : i32
    return %c0_i32, %c0_i32_0 : i32, i32
  }
  func.func @transform_3(%arg0: i32) -> (i32, i32) {
    %c0_i32 = arith.constant 0 : i32
    %c0_i32_0 = arith.constant 0 : i32
    return %arg0, %c0_i32 : i32, i32
  }
}

</mosaic_0001>

<bundles_post_ra>
// kernel: tpu_custom_call.1
= control target key start
LH: loop header
LB: loop body
LE: loop exit
PB: predicated region body
PF: predicated region fallthrough
CT: control target
= control target key end

     0   :  { %s452_s14 = smov 0   ;;  %s500_s0 = inlined_call_operand.vmem [shape: f32[48,64], index: 0, kind: input, shape index: {}]   ;;  %s501_s1 = inlined_call_operand.vmem [shape: f32[64,1], index: 1, kind: input, shape index: {}]   ;;  %s502_s2 = inlined_call_operand.<no memory space> [shape: f32[1,1], index: 2, kind: input, shape index: {}]   ;;  %s503_s3 = inlined_call_operand.vmem [shape: f32[48,1], index: 3, kind: output, shape index: {}]  }
   0x1   :  { %v8_v0 = vstv %s502_s2 }
   0x2   :  { %9 = vst [vmem:[#allocation2] sm:$0x1] %v8_v0 }
   0x3 LB: > { %s346_s15 = sadd.s32 4294967295, %s427_s14   ;;  %p350_p0 = scmp.ge.s32.totalorder %s427_s14, 1  ;;  %s427_s14 = sphi %s452_s14, %s15_s14  }
   0x4   : > { %p140_p1 = scmp.lt.s32.totalorder %s427_s14, 4 }
   0x6   : > { %p141_p2 = pnand %p350_p0, %p140_p1 }
   0x7   : > { %v178_v1 = vld [vmem:[%s501_s1] sm:$0xff] (!%p141_p2)  ;;  %v179_v2 = vld [vmem:[%s501_s1 + $0x8] sm:$0xff] (!%p141_p2)  ;;  %v180_v3 = vld [vmem:[%s501_s1 + $0x10] sm:$0xff] (!%p141_p2)  ;;  %s351_s21 = sshll.u32 (!%p141_p2), %s346_s15, 1  ;;  %vm193_vm0 = vcmask (!%p141_p2), 523264   ;;  %vm287_vm1 = vcmask (!%p141_p2), 7168  }
   0x8   : > { %144 = sbr.rel (%p141_p2) target bundleno = 271 (0x10f), region = 32  ;;  %v389_v4 = vpack.c.bf16 (!%p141_p2), %v179_v2, %v178_v1  ;;  %v181_v5 = vld [vmem:[%s501_s1 + $0x18] sm:$0xff] (!%p141_p2)  ;;  %p165_p3 = scmp.lt.s32.totalorder (!%p141_p2), %s351_s21, 5  ;;  %v182_v7 = vld [vmem:[%s501_s1 + $0x20] sm:$0xff] (!%p141_p2)  ;;  %v183_v8 = vld [vmem:[%s501_s1 + $0x28] sm:$0xff] (!%p141_p2) }
   0x9   : > { %v393_v6 = vpack.c.bf16 (!%p141_p2), %v181_v5, %v180_v3  ;;  %v397_v9 = vpack.c.bf16 (!%p141_p2), %v183_v8, %v182_v7  ;;  %v184_v10 = vld [vmem:[%s501_s1 + $0x30] sm:$0xff] (!%p141_p2)  ;;  %v185_v11 = vld [vmem:[%s501_s1 + $0x38] sm:$0xff] (!%p141_p2)  ;;  %v355_v15 = vld [vmem:[#allocation2] ss:$0 sm:$0xff] (!%p141_p2) }
   0xa   : > { %390 = vmatprep.subr.bf16.mxu0 (!%p141_p2), %v389_v4  ;;  %v401_v13 = vpack.c.bf16 (!%p141_p2), %v185_v11, %v184_v10 }
   0xb   : > { %392 = vmatpush3.bf16.msra.mxu0 (!%p141_p2), %v389_v4 }
   0xc   : > { %394 = vmatprep.subr.bf16.mxu0 (!%p141_p2), %v393_v6 }
   0xf   : > { %s505_s21 = smov (!%p165_p3, %s351_s21), 5  ;;  %396 = vmatpush3.bf16.msra.mxu0 %v393_v6 }
  0x10   : > { %s352_s28 = sshll.u32 %s505_s21, 3  ;;  %398 = vmatprep.subr.bf16.mxu0 %v397_v9 }
  0x11   : > { %s168_s8 = scalar_lea.vmem %s500_s0, %s352_s28  ;;  %s174_s11 = scalar_lea.vmem %s503_s3, %s352_s28 }
  0x12   : > { %v176_v12 = vld [vmem:[%s168_s8] sm:$0xff]  ;;  %v177_v14 = vld [vmem:[%s168_s8 + $0x8] sm:$0xff] }
  0x13   : > { %386 = vmatprep.mubr.msk.f32.mxu0 %vm193_vm0, %v176_v12  ;;  %400 = vmatpush3.bf16.msra.mxu0 %v397_v9 }
  0x14   : > { %402 = vmatprep.subr.bf16.mxu0 %v401_v13 }
  0x17   : > { %404 = vmatpush3.bf16.msra.mxu0 %v401_v13 }
  0x1a   : > { %387 = vmatmul.mubr.msk.f32.vlgmr.msra.gmra.mrb[0].mxu0 %vm193_vm0, %v177_v14 }
  0xed   : > { %v388_v16 = vpop.f32.mrb[0].mxu0 }
  0xee   : > { %v272_v17 = vadd.f32 %v388_v16, %v355_v15  ;;  %v266_v18 = vpop.f32.mrb[1].mxu0 }
  0xef   : > { %v267_v19 = vadd.f32 %v355_v15, %v266_v18 }
  0xf0   : > { %v276_v20 = vsub.f32 0.0, %v272_v17 }
  0xf1   : > { %v275_v21 = vsub.f32 0.0, %v267_v19 }
  0xf2   : > { %v279_v22 = vmul.f32 1.442695, %v276_v20 }
  0xf3   : > { %v277_v23 = vmul.f32 1.442695, %v275_v21 }
  0xf4   : > { %413 = vpow2.f32 %v279_v22 }
  0xf5   : > { %415 = vpow2.f32 %v277_v23 }
  0xfe   : > { %v414_v24 = vpop.eup %413 }
  0xff   : > { %v416_v25 = vpop.eup %415  ;;  %v282_v26 = vadd.f32 1.0, %v414_v24 }
 0x100   : > { %v281_v27 = vadd.f32 1.0, %v416_v25 }
 0x102   : > { %417 = vrcp.f32 %v281_v27 }
 0x103   : > { %419 = vrcp.f32 %v282_v26 }
 0x10c   : > { %v418_v28 = vpop.eup %417 }
 0x10d   : > { %v420_v29 = vpop.eup %419  ;;  %288 = vst.msk [vmem:[%s174_s11] sm:$0xff] %vm287_vm1, %v418_v28 }
 0x10e   : > { %289 = vst.msk [vmem:[%s174_s11 + $0x8] sm:$0xff] %vm287_vm1, %v420_v29 }
 0x10f PF: > { %s15_s14 = sadd.s32 1, %s427_s14  }
 0x110   : > { %p12_p4 = scmp.ge.s32.totalorder %s15_s14, 5  }
 0x112   :  { %14 = sbr.rel (!%p12_p4) target bundleno = 3 (0x3), region = 62 }

</bundles_post_ra>
